<compile_context>
chip_gen: v5e
topology: v5e:2x2
jax: 0.10.0
libtpu: 0.0.40
codegen_flags: <defaults>
</compile_context>

<pallas_src>
import jax
import jax.numpy as jnp
from jax import lax
from jax.experimental import pallas as pl
from jax.experimental.pallas import tpu as pltpu  # noqa: F401  (kept for TPU-specific tuning hooks)

# Module-consistent small sizes.
S = 8          # sequence length
B = 2          # batch size
E = 32         # cfg.encoder_embed_dim
H = 4          # cfg.encoder_attention_heads
HD = E // H    # head dim
F = 64         # cfg.encoder_ffn_embed_dim

EP = 128       # E padded to a full lane tile
FP = 128       # F padded to a full lane tile
N = B * S      # query rows
M = B * H * S  # (batch, head, key) score columns

EPS = 1e-5
NEG_INF = -1e9  # additive mask value (stand-in for -inf; avoids NaN on all-masked rows)


def _layernorm(x, gamma, beta, lanevalid):
    """LayerNorm over the E real lanes of a zero-padded (rows, EP) activation."""
    mu = jnp.sum(x, axis=-1, keepdims=True) * (1.0 / E)
    d = (x - mu) * lanevalid                               # zero out padded lanes
    var = jnp.sum(d * d, axis=-1, keepdims=True) * (1.0 / E)
    # gamma/beta are zero-padded, so padded lanes stay exactly 0.
    return d * lax.rsqrt(var + EPS) * gamma + beta


def encoder_layer_kernel(x_ref, maskbig_ref, headmask_ref, blocksum_ref, lanevalid_ref,
                         wqkv_ref, bqkv_ref, wo_ref, bo_ref, g1_ref, be1_ref,
                         w1_ref, b1_ref, w2_ref, b2_ref, g2_ref, be2_ref,
                         out_ref):
    x = x_ref[...]                    # (N, EP)  real data in lanes [0, E)
    headmask = headmask_ref[...]      # (M, EP)  1.0 where lane belongs to the row's head
    lanevalid = lanevalid_ref[...]    # (1, EP)

    # ---- fused QKV projection (1/sqrt(HD) already folded into the Q weights) ----
    qkv = jnp.dot(x, wqkv_ref[...], preferred_element_type=jnp.float32) + bqkv_ref[...]
    q = qkv[:, 0 * EP:1 * EP]         # (N, EP)
    k = qkv[:, 1 * EP:2 * EP]
    v = qkv[:, 2 * EP:3 * EP]

    # ---- expand K / V to (batch, head, key)-ordered rows, masked to each head's lanes ----
    kblocks, vblocks = [], []
    for b in range(B):                # B, H are tiny static ints
        for _ in range(H):
            kblocks.append(k[b * S:(b + 1) * S, :])
            vblocks.append(v[b * S:(b + 1) * S, :])
    kexp = jnp.concatenate(kblocks, axis=0) * headmask     # (M, EP)
    vexp = jnp.concatenate(vblocks, axis=0) * headmask     # (M, EP)

    # ---- all (batch, head) attention scores in ONE matmul ----
    scores = jnp.dot(q, kexp.T, preferred_element_type=jnp.float32)   # (N, M)
    scores = scores + maskbig_ref[...]   # key padding + cross-batch masking, single add

    # ---- per-(batch, head)-block softmax, stabilised by the row max ----
    rowmax = jnp.max(scores, axis=-1, keepdims=True)
    p = jnp.exp(scores - rowmax)
    # block sums, already broadcast back to every lane of the block (tiny MXU matmul)
    denom = jnp.dot(p, blocksum_ref[...], preferred_element_type=jnp.float32)
    denom = jnp.maximum(denom, 1e-30)    # fully-masked (cross-batch) blocks sum to 0
    p = p * pl.reciprocal(denom, approx=True)

    # ---- context + output projection (heads land back in lanes [h*HD, (h+1)*HD)) ----
    ctx = jnp.dot(p, vexp, preferred_element_type=jnp.float32)          # (N, EP)
    attn = jnp.dot(ctx, wo_ref[...], preferred_element_type=jnp.float32) + bo_ref[...]

    # ---- residual + LayerNorm 1 (dropout = identity in eval mode) ----
    h1 = _layernorm(x + attn, g1_ref[...], be1_ref[...], lanevalid)

    # ---- feed-forward (relu) ----
    f = jnp.dot(h1, w1_ref[...], preferred_element_type=jnp.float32) + b1_ref[...]
    f = jnp.maximum(f, 0.0)
    f = jnp.dot(f, w2_ref[...], preferred_element_type=jnp.float32) + b2_ref[...]

    # ---- residual + LayerNorm 2 ----
    out_ref[...] = _layernorm(h1 + f, g2_ref[...], be2_ref[...], lanevalid)


def _pad2(w, rows, cols):
    return jnp.zeros((rows, cols), jnp.float32).at[:w.shape[0], :w.shape[1]].set(w)


def encoder_layer(inputs_sbe, key_padding_mask, params):
    """inputs_sbe: (S, B, E) float32 (torch MultiheadAttention seq-first layout).
    key_padding_mask: (B, S) bool, True = padded key.  Returns (out_sbe, None)."""
    (wq, bq, wk, bk, wv, bv, wo, bo, g1, be1, w1, b1, w2, b2, g2, be2) = params

    # activations: (S,B,E) -> (B*S, EP), zero-padded, batch-major rows
    x = jnp.transpose(inputs_sbe, (1, 0, 2)).astype(jnp.float32).reshape(N, E)
    xp = _pad2(x, N, EP)

    # fused + padded QKV weight; fold the 1/sqrt(HD) attention scale into the Q block
    scale = 1.0 / (HD ** 0.5)
    wqkv = jnp.zeros((EP, 3 * EP), jnp.float32)
    wqkv = wqkv.at[:E, 0 * EP:0 * EP + E].set(wq * scale)
    wqkv = wqkv.at[:E, 1 * EP:1 * EP + E].set(wk)
    wqkv = wqkv.at[:E, 2 * EP:2 * EP + E].set(wv)
    bqkv = jnp.zeros((1, 3 * EP), jnp.float32)
    bqkv = bqkv.at[:, 0 * EP:0 * EP + E].set(bq * scale)
    bqkv = bqkv.at[:, 1 * EP:1 * EP + E].set(bk)
    bqkv = bqkv.at[:, 2 * EP:2 * EP + E].set(bv)

    wo_p, bo_p = _pad2(wo, EP, EP), _pad2(bo, 1, EP)
    g1_p, be1_p = _pad2(g1, 1, EP), _pad2(be1, 1, EP)
    w1_p, b1_p = _pad2(w1, EP, FP), _pad2(b1, 1, FP)
    w2_p, b2_p = _pad2(w2, FP, EP), _pad2(b2, 1, EP)
    g2_p, be2_p = _pad2(g2, 1, EP), _pad2(be2, 1, EP)

    # additive mask over the (N, M) score matrix; column m = b'*H*S + h*S + j.
    # Masks padded keys and cross-batch blocks (built once here, added once in-kernel).
    keymask = jnp.where(key_padding_mask, NEG_INF, 0.0).astype(jnp.float32)       # (B, S)
    colmask = jnp.tile(keymask[:, None, :], (1, H, 1)).reshape(1, M)              # (1, M)
    rowb = jnp.arange(N)[:, None] // S
    colb = jnp.arange(M)[None, :] // (H * S)
    maskbig = jnp.where(rowb == colb, colmask, NEG_INF).astype(jnp.float32)       # (N, M)

    # structural constants: head-lane mask for the expanded K/V, block-diagonal ones for
    # the softmax block sums, and the valid-lane mask for LayerNorm.
    m_idx = jnp.arange(M)
    c_idx = jnp.arange(EP)
    headmask = (((m_idx[:, None] // S) % H) == (c_idx[None, :] // HD)).astype(jnp.float32)  # (M, EP)
    blocksum = ((m_idx[:, None] // S) == (m_idx[None, :] // S)).astype(jnp.float32)         # (M, M)
    lanevalid = (c_idx[None, :] < E).astype(jnp.float32)                                     # (1, EP)

    out = pl.pallas_call(
        encoder_layer_kernel,
        out_shape=jax.ShapeDtypeStruct((N, EP), jnp.float32),
    )(xp, maskbig, headmask, blocksum, lanevalid,
      wqkv, bqkv, wo_p, bo_p, g1_p, be1_p, w1_p, b1_p, w2_p, b2_p, g2_p, be2_p)

    out_sbe = out[:, :E].reshape(B, S, E).transpose(1, 0, 2)   # back to (S, B, E)
    return out_sbe, None    # need_weights=False -> attn_weights is None


def reference_jax(inputs_sbe, key_padding_mask, params):
    """Plain-JAX reference mirroring torch semantics, for a sanity check."""
    (wq, bq, wk, bk, wv, bv, wo, bo, g1, be1, w1, b1, w2, b2, g2, be2) = params
    x = jnp.transpose(inputs_sbe, (1, 0, 2))                                    # (B,S,E)
    mask = jnp.where(key_padding_mask, NEG_INF, 0.0)[:, None, None, :]          # (B,1,1,S)

    def ln(t, g, be):
        mu = jnp.mean(t, -1, keepdims=True)
        var = jnp.mean((t - mu) ** 2, -1, keepdims=True)
        return (t - mu) * jax.lax.rsqrt(var + EPS) * g + be

    q = (x @ wq + bq).reshape(B, S, H, HD).transpose(0, 2, 1, 3)
    k = (x @ wk + bk).reshape(B, S, H, HD).transpose(0, 2, 1, 3)
    v = (x @ wv + bv).reshape(B, S, H, HD).transpose(0, 2, 1, 3)
    s = jnp.einsum("bhqd,bhkd->bhqk", q, k) / (HD ** 0.5) + mask
    p = jax.nn.softmax(s, axis=-1)
    a = jnp.einsum("bhqk,bhkd->bhqd", p, v).transpose(0, 2, 1, 3).reshape(B, S, E)
    a = a @ wo + bo
    h1 = ln(x + a, g1, be1)
    f = jnp.maximum(h1 @ w1 + b1, 0.0) @ w2 + b2
    out = ln(h1 + f, g2, be2)
    return jnp.transpose(out, (1, 0, 2))


def init_params(key):
    ks = jax.random.split(key, 16)

    def lin(kw, kb, fan_in, fan_out):
        # weight stored as (in, out) so the kernel computes x @ W + b directly
        w = jax.random.normal(kw, (fan_in, fan_out), jnp.float32) * (1.0 / jnp.sqrt(fan_in))
        b = 0.1 * jax.random.normal(kb, (1, fan_out), jnp.float32)
        return w, b

    wq, bq = lin(ks[0], ks[1], E, E)
    wk, bk = lin(ks[2], ks[3], E, E)
    wv, bv = lin(ks[4], ks[5], E, E)
    wo, bo = lin(ks[6], ks[7], E, E)
    w1, b1 = lin(ks[8], ks[9], E, F)
    w2, b2 = lin(ks[10], ks[11], F, E)
    g1 = 1.0 + 0.1 * jax.random.normal(ks[12], (1, E), jnp.float32)
    be1 = 0.1 * jax.random.normal(ks[13], (1, E), jnp.float32)
    g2 = 1.0 + 0.1 * jax.random.normal(ks[14], (1, E), jnp.float32)
    be2 = 0.1 * jax.random.normal(ks[15], (1, E), jnp.float32)
    return (wq, bq, wk, bk, wv, bv, wo, bo, g1, be1, w1, b1, w2, b2, g2, be2)


if __name__ == "__main__":
    key = jax.random.PRNGKey(0)
    k_in, k_param = jax.random.split(key)

    inputs = jax.random.normal(k_in, (S, B, E), jnp.float32)          # (seq, batch, embed)
    # key_padding_mask: last two positions of batch element 1 are padded.
    attn_mask = jnp.zeros((B, S), dtype=bool).at[1, S - 2:].set(True)
    params = init_params(k_param)

    out, attn_weights = encoder_layer(inputs, attn_mask, params)
    out = jax.block_until_ready(out)

    ref = jax.block_until_ready(reference_jax(inputs, attn_mask, params))
    assert out.shape == (S, B, E)
    assert attn_weights is None
    # Tolerance accommodates the EUP approximate-reciprocal softmax normalisation;
    # any structural error would be orders of magnitude larger.
    assert jnp.allclose(out, ref, atol=1e-2, rtol=1e-2), "mismatch vs JAX reference"
    print("KERNEL_OK")
</pallas_src>

<mosaic_0001>
module attributes {stable_mosaic.version = 11 : i64} {
  func.func @encoder_layer_kernel(%arg0: memref<16x128xf32, #tpu.memory_space<vmem>>, %arg1: memref<16x64xf32, #tpu.memory_space<vmem>>, %arg2: memref<64x128xf32, #tpu.memory_space<vmem>>, %arg3: memref<64x64xf32, #tpu.memory_space<vmem>>, %arg4: memref<1x128xf32, #tpu.memory_space<vmem>>, %arg5: memref<128x384xf32, #tpu.memory_space<vmem>>, %arg6: memref<1x384xf32, #tpu.memory_space<vmem>>, %arg7: memref<128x128xf32, #tpu.memory_space<vmem>>, %arg8: memref<1x128xf32, #tpu.memory_space<vmem>>, %arg9: memref<1x128xf32, #tpu.memory_space<vmem>>, %arg10: memref<1x128xf32, #tpu.memory_space<vmem>>, %arg11: memref<128x128xf32, #tpu.memory_space<vmem>>, %arg12: memref<1x128xf32, #tpu.memory_space<vmem>>, %arg13: memref<128x128xf32, #tpu.memory_space<vmem>>, %arg14: memref<1x128xf32, #tpu.memory_space<vmem>>, %arg15: memref<1x128xf32, #tpu.memory_space<vmem>>, %arg16: memref<1x128xf32, #tpu.memory_space<vmem>>, %arg17: memref<16x128xf32, #tpu.memory_space<vmem>>) attributes {dimension_semantics = [], scalar_prefetch = 0 : i64, scratch_operands = 0 : i64, tpu.core_type = #tpu.core_type<tc>} {
    %c0 = arith.constant 0 : index
    %c0_0 = arith.constant 0 : index
    %0 = vector.load %arg0[%c0, %c0_0] : memref<16x128xf32, #tpu.memory_space<vmem>>, vector<16x128xf32>
    %c0_1 = arith.constant 0 : index
    %c0_2 = arith.constant 0 : index
    %1 = vector.load %arg2[%c0_1, %c0_2] : memref<64x128xf32, #tpu.memory_space<vmem>>, vector<64x128xf32>
    %c0_3 = arith.constant 0 : index
    %c0_4 = arith.constant 0 : index
    %2 = vector.load %arg4[%c0_3, %c0_4] : memref<1x128xf32, #tpu.memory_space<vmem>>, vector<1x128xf32>
    %c0_5 = arith.constant 0 : index
    %c0_6 = arith.constant 0 : index
    %3 = vector.load %arg5[%c0_5, %c0_6] : memref<128x384xf32, #tpu.memory_space<vmem>>, vector<128x384xf32>
    %cst = arith.constant dense<0.000000e+00> : vector<16x384xf32>
    %4 = tpu.matmul %0, %3, %cst {dimension_numbers = #tpu.dot_dimension_numbers<[1], [0], [0], [1], [0, 0, 1, 1], [], []>} : vector<16x128xf32>, vector<128x384xf32>, vector<16x384xf32> -> vector<16x384xf32>
    %c0_7 = arith.constant 0 : index
    %c0_8 = arith.constant 0 : index
    %5 = vector.load %arg6[%c0_7, %c0_8] : memref<1x384xf32, #tpu.memory_space<vmem>>, vector<1x384xf32>
    %6 = vector.broadcast %5 : vector<1x384xf32> to vector<16x384xf32>
    %7 = arith.addf %4, %6 : vector<16x384xf32>
    %8 = vector.extract_strided_slice %7 {offsets = [0, 0], sizes = [16, 128], strides = [1, 1]} : vector<16x384xf32> to vector<16x128xf32>
    %9 = vector.extract_strided_slice %7 {offsets = [0, 128], sizes = [16, 128], strides = [1, 1]} : vector<16x384xf32> to vector<16x128xf32>
    %10 = vector.extract_strided_slice %7 {offsets = [0, 256], sizes = [16, 128], strides = [1, 1]} : vector<16x384xf32> to vector<16x128xf32>
    %11 = vector.extract_strided_slice %9 {offsets = [0, 0], sizes = [8, 128], strides = [1, 1]} : vector<16x128xf32> to vector<8x128xf32>
    %12 = vector.extract_strided_slice %10 {offsets = [0, 0], sizes = [8, 128], strides = [1, 1]} : vector<16x128xf32> to vector<8x128xf32>
    %13 = vector.extract_strided_slice %9 {offsets = [0, 0], sizes = [8, 128], strides = [1, 1]} : vector<16x128xf32> to vector<8x128xf32>
    %14 = vector.extract_strided_slice %10 {offsets = [0, 0], sizes = [8, 128], strides = [1, 1]} : vector<16x128xf32> to vector<8x128xf32>
    %15 = vector.extract_strided_slice %9 {offsets = [0, 0], sizes = [8, 128], strides = [1, 1]} : vector<16x128xf32> to vector<8x128xf32>
    %16 = vector.extract_strided_slice %10 {offsets = [0, 0], sizes = [8, 128], strides = [1, 1]} : vector<16x128xf32> to vector<8x128xf32>
    %17 = vector.extract_strided_slice %9 {offsets = [0, 0], sizes = [8, 128], strides = [1, 1]} : vector<16x128xf32> to vector<8x128xf32>
    %18 = vector.extract_strided_slice %10 {offsets = [0, 0], sizes = [8, 128], strides = [1, 1]} : vector<16x128xf32> to vector<8x128xf32>
    %19 = vector.extract_strided_slice %9 {offsets = [8, 0], sizes = [8, 128], strides = [1, 1]} : vector<16x128xf32> to vector<8x128xf32>
    %20 = vector.extract_strided_slice %10 {offsets = [8, 0], sizes = [8, 128], strides = [1, 1]} : vector<16x128xf32> to vector<8x128xf32>
    %21 = vector.extract_strided_slice %9 {offsets = [8, 0], sizes = [8, 128], strides = [1, 1]} : vector<16x128xf32> to vector<8x128xf32>
    %22 = vector.extract_strided_slice %10 {offsets = [8, 0], sizes = [8, 128], strides = [1, 1]} : vector<16x128xf32> to vector<8x128xf32>
    %23 = vector.extract_strided_slice %9 {offsets = [8, 0], sizes = [8, 128], strides = [1, 1]} : vector<16x128xf32> to vector<8x128xf32>
    %24 = vector.extract_strided_slice %10 {offsets = [8, 0], sizes = [8, 128], strides = [1, 1]} : vector<16x128xf32> to vector<8x128xf32>
    %25 = vector.extract_strided_slice %9 {offsets = [8, 0], sizes = [8, 128], strides = [1, 1]} : vector<16x128xf32> to vector<8x128xf32>
    %26 = vector.extract_strided_slice %10 {offsets = [8, 0], sizes = [8, 128], strides = [1, 1]} : vector<16x128xf32> to vector<8x128xf32>
    %27 = tpu.concatenate %11, %13, %15, %17, %19, %21, %23, %25 in 0 : vector<8x128xf32>, vector<8x128xf32>, vector<8x128xf32>, vector<8x128xf32>, vector<8x128xf32>, vector<8x128xf32>, vector<8x128xf32>, vector<8x128xf32> -> vector<64x128xf32>
    %28 = arith.mulf %27, %1 : vector<64x128xf32>
    %29 = tpu.concatenate %12, %14, %16, %18, %20, %22, %24, %26 in 0 : vector<8x128xf32>, vector<8x128xf32>, vector<8x128xf32>, vector<8x128xf32>, vector<8x128xf32>, vector<8x128xf32>, vector<8x128xf32>, vector<8x128xf32> -> vector<64x128xf32>
    %30 = arith.mulf %29, %1 : vector<64x128xf32>
    %31 = tpu.transpose %28, [1, 0] : vector<64x128xf32> -> vector<128x64xf32>
    %cst_9 = arith.constant dense<0.000000e+00> : vector<16x64xf32>
    %32 = tpu.matmul %8, %31, %cst_9 {dimension_numbers = #tpu.dot_dimension_numbers<[1], [0], [0], [1], [0, 0, 1, 1], [], []>} : vector<16x128xf32>, vector<128x64xf32>, vector<16x64xf32> -> vector<16x64xf32>
    %c0_10 = arith.constant 0 : index
    %c0_11 = arith.constant 0 : index
    %33 = vector.load %arg1[%c0_10, %c0_11] : memref<16x64xf32, #tpu.memory_space<vmem>>, vector<16x64xf32>
    %34 = arith.addf %32, %33 : vector<16x64xf32>
    %cst_12 = arith.constant dense<0xFF800000> : vector<16xf32>
    %35 = vector.multi_reduction <maximumf>, %34, %cst_12 [1] : vector<16x64xf32> to vector<16xf32>
    %36 = vector.shape_cast %35 : vector<16xf32> to vector<16x1xf32>
    %37 = vector.broadcast %36 : vector<16x1xf32> to vector<16x64xf32>
    %38 = arith.subf %34, %37 : vector<16x64xf32>
    %39 = math.exp %38 : vector<16x64xf32>
    %c0_13 = arith.constant 0 : index
    %c0_14 = arith.constant 0 : index
    %40 = vector.load %arg3[%c0_13, %c0_14] : memref<64x64xf32, #tpu.memory_space<vmem>>, vector<64x64xf32>
    %cst_15 = arith.constant dense<0.000000e+00> : vector<16x64xf32>
    %41 = tpu.matmul %39, %40, %cst_15 {dimension_numbers = #tpu.dot_dimension_numbers<[1], [0], [0], [1], [0, 0, 1, 1], [], []>} : vector<16x64xf32>, vector<64x64xf32>, vector<16x64xf32> -> vector<16x64xf32>
    %cst_16 = arith.constant 1.000000e-30 : f32
    %42 = vector.broadcast %cst_16 : f32 to vector<16x64xf32>
    %43 = arith.maximumf %41, %42 : vector<16x64xf32>
    %44 = tpu.reciprocal %43 {approx = true} : vector<16x64xf32> -> vector<16x64xf32>
    %45 = arith.mulf %39, %44 : vector<16x64xf32>
    %cst_17 = arith.constant dense<0.000000e+00> : vector<16x128xf32>
    %46 = tpu.matmul %45, %30, %cst_17 {dimension_numbers = #tpu.dot_dimension_numbers<[1], [0], [0], [1], [0, 0, 1, 1], [], []>} : vector<16x64xf32>, vector<64x128xf32>, vector<16x128xf32> -> vector<16x128xf32>
    %c0_18 = arith.constant 0 : index
    %c0_19 = arith.constant 0 : index
    %47 = vector.load %arg7[%c0_18, %c0_19] : memref<128x128xf32, #tpu.memory_space<vmem>>, vector<128x128xf32>
    %cst_20 = arith.constant dense<0.000000e+00> : vector<16x128xf32>
    %48 = tpu.matmul %46, %47, %cst_20 {dimension_numbers = #tpu.dot_dimension_numbers<[1], [0], [0], [1], [0, 0, 1, 1], [], []>} : vector<16x128xf32>, vector<128x128xf32>, vector<16x128xf32> -> vector<16x128xf32>
    %c0_21 = arith.constant 0 : index
    %c0_22 = arith.constant 0 : index
    %49 = vector.load %arg8[%c0_21, %c0_22] : memref<1x128xf32, #tpu.memory_space<vmem>>, vector<1x128xf32>
    %50 = vector.broadcast %49 : vector<1x128xf32> to vector<16x128xf32>
    %51 = arith.addf %48, %50 : vector<16x128xf32>
    %52 = arith.addf %0, %51 : vector<16x128xf32>
    %c0_23 = arith.constant 0 : index
    %c0_24 = arith.constant 0 : index
    %53 = vector.load %arg9[%c0_23, %c0_24] : memref<1x128xf32, #tpu.memory_space<vmem>>, vector<1x128xf32>
    %c0_25 = arith.constant 0 : index
    %c0_26 = arith.constant 0 : index
    %54 = vector.load %arg10[%c0_25, %c0_26] : memref<1x128xf32, #tpu.memory_space<vmem>>, vector<1x128xf32>
    %cst_27 = arith.constant dense<0.000000e+00> : vector<16xf32>
    %55 = vector.multi_reduction <add>, %52, %cst_27 [1] : vector<16x128xf32> to vector<16xf32>
    %56 = vector.shape_cast %55 : vector<16xf32> to vector<16x1xf32>
    %cst_28 = arith.constant 3.125000e-02 : f32
    %57 = vector.broadcast %cst_28 : f32 to vector<16x1xf32>
    %58 = arith.mulf %56, %57 : vector<16x1xf32>
    %59 = vector.broadcast %58 : vector<16x1xf32> to vector<16x128xf32>
    %60 = arith.subf %52, %59 : vector<16x128xf32>
    %61 = vector.broadcast %2 : vector<1x128xf32> to vector<16x128xf32>
    %62 = arith.mulf %60, %61 : vector<16x128xf32>
    %63 = arith.mulf %62, %62 : vector<16x128xf32>
    %cst_29 = arith.constant dense<0.000000e+00> : vector<16xf32>
    %64 = vector.multi_reduction <add>, %63, %cst_29 [1] : vector<16x128xf32> to vector<16xf32>
    %65 = vector.shape_cast %64 : vector<16xf32> to vector<16x1xf32>
    %cst_30 = arith.constant 3.125000e-02 : f32
    %66 = vector.broadcast %cst_30 : f32 to vector<16x1xf32>
    %67 = arith.mulf %65, %66 : vector<16x1xf32>
    %cst_31 = arith.constant 9.99999974E-6 : f32
    %68 = vector.broadcast %cst_31 : f32 to vector<16x1xf32>
    %69 = arith.addf %67, %68 : vector<16x1xf32>
    %70 = math.rsqrt %69 : vector<16x1xf32>
    %71 = vector.broadcast %70 : vector<16x1xf32> to vector<16x128xf32>
    %72 = arith.mulf %62, %71 : vector<16x128xf32>
    %73 = vector.broadcast %53 : vector<1x128xf32> to vector<16x128xf32>
    %74 = arith.mulf %72, %73 : vector<16x128xf32>
    %75 = vector.broadcast %54 : vector<1x128xf32> to vector<16x128xf32>
    %76 = arith.addf %74, %75 : vector<16x128xf32>
    %c0_32 = arith.constant 0 : index
    %c0_33 = arith.constant 0 : index
    %77 = vector.load %arg11[%c0_32, %c0_33] : memref<128x128xf32, #tpu.memory_space<vmem>>, vector<128x128xf32>
    %cst_34 = arith.constant dense<0.000000e+00> : vector<16x128xf32>
    %78 = tpu.matmul %76, %77, %cst_34 {dimension_numbers = #tpu.dot_dimension_numbers<[1], [0], [0], [1], [0, 0, 1, 1], [], []>} : vector<16x128xf32>, vector<128x128xf32>, vector<16x128xf32> -> vector<16x128xf32>
    %c0_35 = arith.constant 0 : index
    %c0_36 = arith.constant 0 : index
    %79 = vector.load %arg12[%c0_35, %c0_36] : memref<1x128xf32, #tpu.memory_space<vmem>>, vector<1x128xf32>
    %80 = vector.broadcast %79 : vector<1x128xf32> to vector<16x128xf32>
    %81 = arith.addf %78, %80 : vector<16x128xf32>
    %cst_37 = arith.constant 0.000000e+00 : f32
    %82 = vector.broadcast %cst_37 : f32 to vector<16x128xf32>
    %83 = arith.maximumf %81, %82 : vector<16x128xf32>
    %c0_38 = arith.constant 0 : index
    %c0_39 = arith.constant 0 : index
    %84 = vector.load %arg13[%c0_38, %c0_39] : memref<128x128xf32, #tpu.memory_space<vmem>>, vector<128x128xf32>
    %cst_40 = arith.constant dense<0.000000e+00> : vector<16x128xf32>
    %85 = tpu.matmul %83, %84, %cst_40 {dimension_numbers = #tpu.dot_dimension_numbers<[1], [0], [0], [1], [0, 0, 1, 1], [], []>} : vector<16x128xf32>, vector<128x128xf32>, vector<16x128xf32> -> vector<16x128xf32>
    %c0_41 = arith.constant 0 : index
    %c0_42 = arith.constant 0 : index
    %86 = vector.load %arg14[%c0_41, %c0_42] : memref<1x128xf32, #tpu.memory_space<vmem>>, vector<1x128xf32>
    %87 = vector.broadcast %86 : vector<1x128xf32> to vector<16x128xf32>
    %88 = arith.addf %85, %87 : vector<16x128xf32>
    %89 = arith.addf %76, %88 : vector<16x128xf32>
    %c0_43 = arith.constant 0 : index
    %c0_44 = arith.constant 0 : index
    %90 = vector.load %arg15[%c0_43, %c0_44] : memref<1x128xf32, #tpu.memory_space<vmem>>, vector<1x128xf32>
    %c0_45 = arith.constant 0 : index
    %c0_46 = arith.constant 0 : index
    %91 = vector.load %arg16[%c0_45, %c0_46] : memref<1x128xf32, #tpu.memory_space<vmem>>, vector<1x128xf32>
    %cst_47 = arith.constant dense<0.000000e+00> : vector<16xf32>
    %92 = vector.multi_reduction <add>, %89, %cst_47 [1] : vector<16x128xf32> to vector<16xf32>
    %93 = vector.shape_cast %92 : vector<16xf32> to vector<16x1xf32>
    %cst_48 = arith.constant 3.125000e-02 : f32
    %94 = vector.broadcast %cst_48 : f32 to vector<16x1xf32>
    %95 = arith.mulf %93, %94 : vector<16x1xf32>
    %96 = vector.broadcast %95 : vector<16x1xf32> to vector<16x128xf32>
    %97 = arith.subf %89, %96 : vector<16x128xf32>
    %98 = vector.broadcast %2 : vector<1x128xf32> to vector<16x128xf32>
    %99 = arith.mulf %97, %98 : vector<16x128xf32>
    %100 = arith.mulf %99, %99 : vector<16x128xf32>
    %cst_49 = arith.constant dense<0.000000e+00> : vector<16xf32>
    %101 = vector.multi_reduction <add>, %100, %cst_49 [1] : vector<16x128xf32> to vector<16xf32>
    %102 = vector.shape_cast %101 : vector<16xf32> to vector<16x1xf32>
    %cst_50 = arith.constant 3.125000e-02 : f32
    %103 = vector.broadcast %cst_50 : f32 to vector<16x1xf32>
    %104 = arith.mulf %102, %103 : vector<16x1xf32>
    %cst_51 = arith.constant 9.99999974E-6 : f32
    %105 = vector.broadcast %cst_51 : f32 to vector<16x1xf32>
    %106 = arith.addf %104, %105 : vector<16x1xf32>
    %107 = math.rsqrt %106 : vector<16x1xf32>
    %108 = vector.broadcast %107 : vector<16x1xf32> to vector<16x128xf32>
    %109 = arith.mulf %99, %108 : vector<16x128xf32>
    %110 = vector.broadcast %90 : vector<1x128xf32> to vector<16x128xf32>
    %111 = arith.mulf %109, %110 : vector<16x128xf32>
    %112 = vector.broadcast %91 : vector<1x128xf32> to vector<16x128xf32>
    %113 = arith.addf %111, %112 : vector<16x128xf32>
    %c0_52 = arith.constant 0 : index
    %c0_53 = arith.constant 0 : index
    %114 = vector.load %arg17[%c0_52, %c0_53] : memref<16x128xf32, #tpu.memory_space<vmem>>, vector<16x128xf32>
    tpu.vector_store %arg17[%c0_52, %c0_53], %113 {strides = array<i32>} : memref<16x128xf32, #tpu.memory_space<vmem>>, vector<16x128xf32>,
    return
  }
}

</mosaic_0001>

<bundles_post_ra>
// kernel: tpu_custom_call.1
= control target key start
LH: loop header
LB: loop body
LE: loop exit
PB: predicated region body
PF: predicated region fallthrough
CT: control target
= control target key end

     0   :  { %s1240_s0 = inlined_call_operand.hbm [shape: f32[16,128], index: 0, kind: input, shape index: {}]   ;;  %s1241_s1 = inlined_call_operand.hbm [shape: f32[16,64], index: 1, kind: input, shape index: {}]   ;;  %s1242_s2 = inlined_call_operand.hbm [shape: f32[64,128], index: 2, kind: input, shape index: {}]   ;;  %s1243_s3 = inlined_call_operand.hbm [shape: f32[64,64], index: 3, kind: input, shape index: {}]   ;;  %s1244_s4 = inlined_call_operand.vmem [shape: f32[1,128], index: 4, kind: input, shape index: {}]   ;;  %s1245_s5 = inlined_call_operand.hbm [shape: f32[128,384], index: 5, kind: input, shape index: {}]   ;;  %s1246_s6 = inlined_call_operand.vmem [shape: f32[1,384], index: 6, kind: input, shape index: {}]   ;;  %s1247_s7 = inlined_call_operand.hbm [shape: f32[128,128], index: 7, kind: input, shape index: {}]   ;;  %s1248_s8 = inlined_call_operand.vmem [shape: f32[1,128], index: 8, kind: input, shape index: {}]   ;;  %s1249_s9 = inlined_call_operand.vmem [shape: f32[1,128], index: 9, kind: input, shape index: {}]   ;;  %s1250_s10 = inlined_call_operand.vmem [shape: f32[1,128], index: 10, kind: input, shape index: {}]   ;;  %s1251_s11 = inlined_call_operand.hbm [shape: f32[128,128], index: 11, kind: input, shape index: {}]   ;;  %s1252_s12 = inlined_call_operand.vmem [shape: f32[1,128], index: 12, kind: input, shape index: {}]   ;;  %s1253_s13 = inlined_call_operand.hbm [shape: f32[128,128], index: 13, kind: input, shape index: {}]   ;;  %s1254_s14 = inlined_call_operand.vmem [shape: f32[1,128], index: 14, kind: input, shape index: {}]   ;;  %s1255_s15 = inlined_call_operand.vmem [shape: f32[1,128], index: 15, kind: input, shape index: {}]   ;;  %s1256_s16 = inlined_call_operand.vmem [shape: f32[1,128], index: 16, kind: input, shape index: {}]   ;;  %s1257_s17 = inlined_call_operand.hbm [shape: f32[16,128], index: 17, kind: output, shape index: {}]  }
   0x1   :  { %1258 = sst [smem:[#allocation23_spill]] %s1240_s0 }
   0x2   :  { %1259 = sst [smem:[#allocation24_spill]] %s1241_s1 }
   0x3   :  { %22 = vsyncpa [#allocation3], 0 }
   0x4   :  { %23 = vsyncpa [#allocation6], 0 }
   0x5   :  { %24 = vsyncpa [#allocation9], 0 }
   0x6   :  { %25 = vsyncpa [#allocation12], 0 }
   0x7   :  { %26 = vsyncpa [#allocation15], 0 }
   0x8   :  { %27 = vsyncpa [#allocation4], 0  ;;  %s1260_s26 = sld [smem:[#allocation24_spill]]  ;;  %s984_s28 = smov [#allocation5]  }
   0x9   :  { %s47_s29 = sshll.u32 %s984_s28, 4  ;;  %s71_s18 = sshll.u32 %s1243_s3, 4  ;;  %s48_s29 = int_to_ptr.vmem [resolvable:$true] %s47_s29  ;;  %s72_s18 = int_to_ptr.hbm [resolvable:$true] %s71_s18 }
   0xa   :  { %s985_s19 = smov 128   ;;  %s986_s1 = smov 8  }
   0xb   :  { %s987_s20 = smov [#allocation8]   ;;  %s101_s24 = sshll.u32 %s1247_s7, 4  ;;  %s102_s24 = int_to_ptr.hbm [resolvable:$true] %s101_s24 }
   0xc   :  { %s73_s21 = sshll.u32 %s987_s20, 4  ;;  %s988_s0 = smov [#allocation11]   ;;  %s74_s21 = int_to_ptr.vmem [resolvable:$true] %s73_s21 }
   0xd   :  { %79 = dma.hbm_to_vmem [thread:$0]  %s72_s18, 1024, %s74_s21, [#allocation9], %s985_s19, %s985_s19, %s986_s1  }
   0xe   :  { %s45_s27 = sshll.u32 %s1260_s26, 4  ;;  %s1261_s26 = sld [smem:[#allocation23_spill]]  ;;  %s46_s27 = int_to_ptr.hbm [resolvable:$true] %s45_s27 }
   0xf   :  { %53 = dma.hbm_to_vmem [thread:$0]  %s46_s27, 256, %s48_s29, [#allocation6], %s985_s19, %s985_s19, %s986_s1  }
  0x10   :  { %s103_s30 = sshll.u32 %s988_s0, 4  ;;  %s989_s27 = smov [#allocation2]   ;;  %s104_s30 = int_to_ptr.vmem [resolvable:$true] %s103_s30 }
  0x11   :  { %109 = dma.hbm_to_vmem [thread:$0]  %s102_s24, 2048, %s104_s30, [#allocation12], %s985_s19, %s985_s19, %s986_s1  }
  0x12   :  { %s34_s7 = sshll.u32 %s989_s27, 4  ;;  %s58_s22 = sshll.u32 %s1242_s2, 4  ;;  %s35_s7 = int_to_ptr.vmem [resolvable:$true] %s34_s7  ;;  %s59_s22 = int_to_ptr.hbm [resolvable:$true] %s58_s22 }
  0x13   :  { %s86_s23 = sshll.u32 %s1245_s5, 4  ;;  %s990_s3 = smov [#allocation7]   ;;  %s87_s23 = int_to_ptr.hbm [resolvable:$true] %s86_s23 }
  0x14   :  { %s32_s28 = sshll.u32 %s1261_s26, 4  ;;  %s60_s25 = sshll.u32 %s990_s3, 4  ;;  %s33_s28 = int_to_ptr.hbm [resolvable:$true] %s32_s28  ;;  %s61_s25 = int_to_ptr.vmem [resolvable:$true] %s60_s25 }
  0x15   :  { %40 = dma.hbm_to_vmem [thread:$0]  %s33_s28, 256, %s35_s7, [#allocation3], %s985_s19, %s985_s19, %s986_s1  }
  0x16   :  { %66 = dma.hbm_to_vmem [thread:$0]  %s59_s22, 1024, %s61_s25, [#allocation6], %s985_s19, %s985_s19, %s986_s1  }
  0x17   :  { %s991_s24 = smov [#allocation10]   ;;  %s992_s26 = smov 384  }
  0x18   :  { %s88_s2 = sshll.u32 %s991_s24, 4  ;;  %s993_s0 = smov 24   ;;  %s89_s2 = int_to_ptr.vmem [resolvable:$true] %s88_s2 }
  0x19   :  { %94 = dma.hbm_to_vmem [thread:$0]  %s87_s23, 6144, %s89_s2, [#allocation9], %s992_s26, %s992_s26, %s993_s0  }
  0x1a   :  { %s120_s27 = sshll.u32 %s1251_s11, 4  ;;  %s994_s5 = smov [#allocation13]   ;;  %s121_s27 = int_to_ptr.hbm [resolvable:$true] %s120_s27 }
  0x1b   :  { %s122_s7 = sshll.u32 %s994_s5, 4  ;;  %s135_s18 = sshll.u32 %s1253_s13, 4  ;;  %s123_s7 = int_to_ptr.vmem [resolvable:$true] %s122_s7  ;;  %s136_s18 = int_to_ptr.hbm [resolvable:$true] %s135_s18 }
  0x1c   :  { %128 = dma.hbm_to_vmem [thread:$0]  %s121_s27, 2048, %s123_s7, [#allocation12], %s985_s19, %s985_s19, %s986_s1  }
  0x1d   :  { %s995_s22 = smov [#allocation14]  }
  0x1e   :  { %s137_s21 = sshll.u32 %s995_s22, 4  ;;  %s138_s21 = int_to_ptr.vmem [resolvable:$true] %s137_s21 }
  0x1f   :  { %143 = dma.hbm_to_vmem [thread:$0]  %s136_s18, 2048, %s138_s21, [#allocation15], %s985_s19, %s985_s19, %s986_s1  }
  0x20   :  { %972 = dma.done.wait [#allocation3], 256  }
  0x21   :  { %973 = vsyncadd [#allocation3], 4294967040 }
  0x22   :  { %974 = dma.done.wait [#allocation6], 1280  }
  0x23   :  { %975 = vsyncadd [#allocation6], 4294966016 }
  0x24   :  { %976 = dma.done.wait [#allocation9], 7168  }
  0x25   :  { %977 = vsyncadd [#allocation9], 4294960128 }
  0x26   :  { %978 = dma.done.wait [#allocation12], 4096  }
  0x27   :  { %979 = vsyncadd [#allocation12], 4294963200 }
  0x28   :  { %980 = dma.done.wait [#allocation15], 2048  }
  0x29   :  { %981 = vsyncadd [#allocation15], 4294965248  ;;  %v239_v0 = vld [vmem:[#allocation10 + $0x170] sm:$0xff]  ;;  %v236_v1 = vld [vmem:[#allocation10 + $0x158] sm:$0xff]  ;;  %vm359_vm0 = vcmask 523264   ;;  %s996_s27 = smov [#allocation16]  }
  0x2a   :  { %272 = vmatpush.msra.mxu1 %v239_v0  ;;  %v233_v2 = vld [vmem:[#allocation10 + $0x140] sm:$0xff]  ;;  %v230_v3 = vld [vmem:[#allocation10 + $0x128] sm:$0xff]  ;;  %v227_v4 = vld [vmem:[#allocation10 + $0x110] sm:$0xff]  ;;  %s698_s29 = sshll.u32 %s1257_s17, 4  ;;  %s699_s29 = int_to_ptr.hbm [resolvable:$true] %s698_s29 }
  0x2b   :  { %v224_v5 = vld [vmem:[#allocation10 + $0xf8] sm:$0xff]  ;;  %v238_v6 = vld [vmem:[#allocation10 + $0x168] sm:$0xff]  ;;  %v235_v7 = vld [vmem:[#allocation10 + $0x150] sm:$0xff] }
  0x2c   :  { %273 = vmatpush.msra.mxu1 %v236_v1  ;;  %249 = vmatpush.msra.mxu0 %v238_v6  ;;  %v221_v8 = vld [vmem:[#allocation10 + $0xe0] sm:$0xff]  ;;  %v232_v9 = vld [vmem:[#allocation10 + $0x138] sm:$0xff]  ;;  %v218_v10 = vld [vmem:[#allocation10 + $0xc8] sm:$0xff] }
  0x2d   :  { %v229_v11 = vld [vmem:[#allocation10 + $0x120] sm:$0xff]  ;;  %v215_v12 = vld [vmem:[#allocation10 + $0xb0] sm:$0xff]  ;;  %v226_v13 = vld [vmem:[#allocation10 + $0x108] sm:$0xff] }
  0x2e   :  { %274 = vmatpush.msra.mxu1 %v233_v2  ;;  %250 = vmatpush.msra.mxu0 %v235_v7  ;;  %v212_v14 = vld [vmem:[#allocation10 + $0x98] sm:$0xff]  ;;  %v223_v15 = vld [vmem:[#allocation10 + $0xf0] sm:$0xff]  ;;  %v209_v16 = vld [vmem:[#allocation10 + $0x80] sm:$0xff] }
  0x2f   :  { %v220_v17 = vld [vmem:[#allocation10 + $0xd8] sm:$0xff]  ;;  %v206_v18 = vld [vmem:[#allocation10 + $0x68] sm:$0xff]  ;;  %v217_v19 = vld [vmem:[#allocation10 + $0xc0] sm:$0xff] }
  0x30   :  { %275 = vmatpush.msra.mxu1 %v230_v3  ;;  %251 = vmatpush.msra.mxu0 %v232_v9  ;;  %v203_v20 = vld [vmem:[#allocation10 + $0x50] sm:$0xff]  ;;  %v214_v21 = vld [vmem:[#allocation10 + $0xa8] sm:$0xff]  ;;  %v200_v22 = vld [vmem:[#allocation10 + $0x38] sm:$0xff] }
  0x31   :  { %v211_v23 = vld [vmem:[#allocation10 + $0x90] sm:$0xff]  ;;  %v197_v24 = vld [vmem:[#allocation10 + $0x20] sm:$0xff]  ;;  %v208_v25 = vld [vmem:[#allocation10 + $0x78] sm:$0xff] }
  0x32   :  { %276 = vmatpush.msra.mxu1 %v227_v4  ;;  %252 = vmatpush.msra.mxu0 %v229_v11  ;;  %v194_v26 = vld [vmem:[#allocation10 + $0x8] sm:$0xff]  ;;  %v205_v27 = vld [vmem:[#allocation10 + $0x60] sm:$0xff]  ;;  %v199_v30 = vld [vmem:[#allocation10 + $0x30] sm:$0xff] }
  0x33   :  { %v1132_v28 = vld [vmem:[#allocation2] sm:$0xff]  ;;  %v202_v29 = vld [vmem:[#allocation10 + $0x48] sm:$0xff]  ;;  %v196_v31 = vld [vmem:[#allocation10 + $0x18] sm:$0xff] }
  0x34   :  { %277 = vmatpush.msra.mxu1 %v224_v5  ;;  %253 = vmatpush.msra.mxu0 %v226_v13  ;;  %v193_v32 = vld [vmem:[#allocation10] sm:$0xff]  ;;  %v1135_v33 = vld [vmem:[#allocation2 + $0x8] sm:$0xff]  ;;  %v1146_v38 = vld [vmem:[#allocation7 + $0x38] sm:$0xff] }
  0x35   :  { %v1143_v35 = vld [vmem:[%s1246_s6] sm:$0x7]  ;;  %v1149_v41 = vld [vmem:[#allocation7 + $0x30] sm:$0xff]  ;;  %v1152_v43 = vld [vmem:[#allocation7 + $0x28] sm:$0xff] }
  0x36   :  { %278 = vmatpush.msra.mxu1 %v221_v8  ;;  %254 = vmatpush.msra.mxu0 %v223_v15  ;;  %v244_v36 = vperm.slane %v1143_v35, 1  ;;  %v1155_v45 = vld [vmem:[#allocation7 + $0x20] sm:$0xff]  ;;  %v1158_v48 = vld [vmem:[#allocation7 + $0x18] sm:$0xff]  ;;  %v1161_v50 = vld [vmem:[#allocation7 + $0x10] sm:$0xff]  ;;  %v243_v55 = vperm.slane %v1143_v35, 0 }
  0x37   :  { %v1164_v52 = vld [vmem:[#allocation7 + $0x8] sm:$0xff]  ;;  %v1168_v56 = vld [vmem:[#allocation7] sm:$0xff]  ;;  %v240_v61 = vld [vmem:[#allocation10 + $0x178] sm:$0xff] }
  0x38   :  { %279 = vmatpush.msra.mxu1 %v218_v10  ;;  %255 = vmatpush.msra.mxu0 %v220_v17  ;;  %v237_v62 = vld [vmem:[#allocation10 + $0x160] sm:$0xff]  ;;  %v234_v63 = vld [vmem:[#allocation10 + $0x148] sm:$0xff]  ;;  %v231_v0 = vld [vmem:[#allocation10 + $0x130] sm:$0xff] }
  0x39   :  { %295 = vmatpush.msra.mxu2 %v240_v61  ;;  %v228_v1 = vld [vmem:[#allocation10 + $0x118] sm:$0xff]  ;;  %v225_v2 = vld [vmem:[#allocation10 + $0x100] sm:$0xff]  ;;  %v378_v4 = vld [vmem:[#allocation8 + $0x30] sm:$0xff] }
  0x3a   :  { %280 = vmatpush.msra.mxu1 %v215_v12  ;;  %256 = vmatpush.msra.mxu0 %v217_v19  ;;  %v379_v3 = vld [vmem:[#allocation8 + $0x38] sm:$0xff]  ;;  %v222_v5 = vld [vmem:[#allocation10 + $0xe8] sm:$0xff]  ;;  %v219_v7 = vld [vmem:[#allocation10 + $0xd0] sm:$0xff] }
  0x3b   :  { %296 = vmatpush.msra.mxu2 %v237_v62  ;;  %v377_v6 = vld [vmem:[#allocation8 + $0x28] sm:$0xff]  ;;  %v216_v8 = vld [vmem:[#allocation10 + $0xb8] sm:$0xff]  ;;  %v213_v9 = vld [vmem:[#allocation10 + $0xa0] sm:$0xff] }
  0x3c   :  { %281 = vmatpush.msra.mxu1 %v212_v14  ;;  %257 = vmatpush.msra.mxu0 %v214_v21  ;;  %v334_v10 = vld [vmem:[#allocation5] sm:$0xff]  ;;  %v210_v11 = vld [vmem:[#allocation10 + $0x88] sm:$0xff]  ;;  %v204_v15 = vld [vmem:[#allocation10 + $0x58] sm:$0xff] }
  0x3d   :  { %297 = vmatpush.msra.mxu2 %v234_v63  ;;  %v207_v13 = vld [vmem:[#allocation10 + $0x70] sm:$0xff]  ;;  %v201_v17 = vld [vmem:[#allocation10 + $0x40] sm:$0xff]  ;;  %v198_v19 = vld [vmem:[#allocation10 + $0x28] sm:$0xff] }
  0x3e   :  { %282 = vmatpush.msra.mxu1 %v209_v16  ;;  %258 = vmatpush.msra.mxu0 %v211_v23  ;;  %v195_v21 = vld [vmem:[#allocation10 + $0x10] sm:$0xff] }
  0x3f   :  { %298 = vmatpush.msra.mxu2 %v231_v0  ;;  %v450_v63 = vld [vmem:[#allocation11 + $0x30] sm:$0xff]  ;;  %v449_v0 = vld [vmem:[#allocation11 + $0x28] sm:$0xff] }
  0x40   :  { %283 = vmatpush.msra.mxu1 %v206_v18  ;;  %259 = vmatpush.msra.mxu0 %v208_v25  ;;  %v335_v18 = vld [vmem:[#allocation5 + $0x8] sm:$0xff] }
  0x41   :  { %299 = vmatpush.msra.mxu2 %v228_v1  ;;  %v375_v25 = vld [vmem:[#allocation8 + $0x18] sm:$0xff] }
  0x42   :  { %284 = vmatpush.msra.mxu1 %v203_v20  ;;  %260 = vmatpush.msra.mxu0 %v205_v27  ;;  %v373_v27 = vld [vmem:[#allocation8 + $0x8] sm:$0xff] }
  0x43   :  { %300 = vmatpush.msra.mxu2 %v225_v2  ;;  %v448_v2 = vld [vmem:[#allocation11 + $0x20] sm:$0xff] }
  0x44   :  { %285 = vmatpush.msra.mxu1 %v200_v22  ;;  %261 = vmatpush.msra.mxu0 %v202_v29  ;;  %v372_v29 = vld [vmem:[#allocation8] sm:$0xff] }
  0x45   :  { %301 = vmatpush.msra.mxu2 %v222_v5 }
  0x46   :  { %286 = vmatpush.msra.mxu1 %v197_v24  ;;  %262 = vmatpush.msra.mxu0 %v199_v30  ;;  %v376_v24 = vld [vmem:[#allocation8 + $0x20] sm:$0xff] }
  0x47   :  { %302 = vmatpush.msra.mxu2 %v219_v7  ;;  %v446_v7 = vld [vmem:[#allocation11 + $0x10] sm:$0xff] }
  0x48   :  { %287 = vmatpush.msra.mxu1 %v194_v26  ;;  %263 = vmatpush.msra.mxu0 %v196_v31  ;;  %v374_v26 = vld [vmem:[#allocation8 + $0x10] sm:$0xff] }
  0x49   :  { %288 = vmatmul.f32.vlgmr.msra.gmra.mxu1 %v1132_v28  ;;  %303 = vmatpush.msra.mxu2 %v216_v8  ;;  %v445_v8 = vld [vmem:[#allocation11 + $0x8] sm:$0xff] }
  0x4a   :  { %264 = vmatpush.msra.mxu0 %v193_v32  ;;  %394 = vmatpush.msrb.mxu1 %v379_v3 }
  0x4b   :  { %265 = vmatmul.f32.vlgmr.msra.gmra.mxu0 %v1132_v28  ;;  %304 = vmatpush.msra.mxu2 %v213_v9 }
  0x4c   :  { %395 = vmatpush.msrb.mxu1 %v378_v4 }
  0x4d   :  { %305 = vmatpush.msra.mxu2 %v210_v11  ;;  %v444_v11 = vld [vmem:[#allocation11] sm:$0xff] }
  0x4e   :  { %396 = vmatpush.msrb.mxu1 %v377_v6  ;;  %v447_v6 = vld [vmem:[#allocation11 + $0x18] sm:$0xff] }
  0x4f   :  { %306 = vmatpush.msra.mxu2 %v207_v13 }
  0x50   :  { %397 = vmatpush.msrb.mxu1 %v376_v24 }
  0x51   :  { %291 = vmatmul.f32.gmra.mxu1 %v1135_v33  ;;  %307 = vmatpush.msra.mxu2 %v204_v15 }
  0x52   :  { %398 = vmatpush.msrb.mxu1 %v375_v25  ;;  %v1200_v25 = vld [vmem:[%s1244_s4] ss:$0 sm:$0xff] }
  0x53   :  { %268 = vmatmul.f32.gmra.mxu0 %v1135_v33  ;;  %308 = vmatpush.msra.mxu2 %v201_v17 }
  0x54   :  { %399 = vmatpush.msrb.mxu1 %v374_v26 }
  0x55   :  { %309 = vmatpush.msra.mxu2 %v198_v19 }
  0x56   :  { %400 = vmatpush.msrb.mxu1 %v373_v27 }
  0x57   :  { %310 = vmatpush.msra.mxu2 %v195_v21  ;;  %v561_v21 = vld [vmem:[#allocation13 + $0x78] sm:$0xff] }
  0x58   :  { %311 = vmatmul.f32.vlgmr.msra.gmra.mxu2 %v1132_v28  ;;  %401 = vmatpush.msrb.mxu1 %v372_v29 }
  0x60   :  { %314 = vmatmul.f32.gmra.mxu2 %v1135_v33 }
  0xc6   :  { %v289_v34 = vpop.f32.mrf.mxu1 }
  0xc7   :  { %v290_v46 = vadd.f32 %v289_v34, %v244_v36 }
  0xc8   :  { %v266_v54 = vpop.f32.mrf.mxu0 }
  0xc9   :  { %v321_v49 = vmul.f32 %v290_v46, %v1158_v48  ;;  %v320_v51 = vmul.f32 %v290_v46, %v1161_v50  ;;  %v319_v53 = vmul.f32 %v290_v46, %v1164_v52  ;;  %v318_v57 = vmul.f32 %v290_v46, %v1168_v56 }
  0xca   :  { %v267_v58 = vadd.f32 %v266_v54, %v243_v55 }
  0xce   :  { %v292_v37 = vpop.f32.mrf.mxu1 }
  0xcf   :  { %v293_v39 = vadd.f32 %v292_v37, %v244_v36 }
  0xd0   :  { %v269_v59 = vpop.f32.mrf.mxu0 }
  0xd1   :  { %v325_v40 = vmul.f32 %v293_v39, %v1146_v38  ;;  %v324_v42 = vmul.f32 %v293_v39, %v1149_v41  ;;  %v323_v44 = vmul.f32 %v293_v39, %v1152_v43  ;;  %v322_v47 = vmul.f32 %v293_v39, %v1155_v45 }
  0xd2   :  { %v270_v60 = vadd.f32 %v269_v59, %v243_v55  ;;  %v458_v59 = vld [vmem:[#allocation11 + $0x70] sm:$0xff] }
  0xd3   :  { %344 = vmatpush.xpose.msra.mxu3 %v325_v40 }
  0xd7   :  { %345 = vmatpush.xpose.msra.mxu3 %v324_v42 }
  0xdb   :  { %346 = vmatpush.xpose.msra.mxu3 %v323_v44  ;;  %v312_v42 = vpop.f32.mrf.mxu2  ;;  %v245_v44 = vperm.slane %v1143_v35, 2 }
  0xdf   :  { %347 = vmatpush.xpose.msra.mxu3 %v322_v47 }
  0xe3   :  { %348 = vmatpush.xpose.msra.mxu3 %v321_v49  ;;  %v315_v46 = vpop.f32.mrf.mxu2 }
  0xe4   :  { %v316_v47 = vadd.f32 %v315_v46, %v245_v44  ;;  %v552_v46 = vld [vmem:[#allocation13 + $0x30] sm:$0xff] }
  0xe6   :  { %v333_v49 = vmul.f32 %v316_v47, %v1146_v38  ;;  %v331_v54 = vmul.f32 %v316_v47, %v1152_v43  ;;  %v330_v55 = vmul.f32 %v316_v47, %v1155_v45  ;;  %v457_v43 = vld [vmem:[#allocation11 + $0x68] sm:$0xff]  ;;  %v456_v45 = vld [vmem:[#allocation11 + $0x60] sm:$0xff] }
  0xe7   :  { %349 = vmatpush.xpose.msra.mxu3 %v320_v51  ;;  %v332_v51 = vmul.f32 %v316_v47, %v1149_v41  ;;  %v459_v41 = vld [vmem:[#allocation11 + $0x78] sm:$0xff]  ;;  %v551_v47 = vld [vmem:[#allocation13 + $0x28] sm:$0xff] }
  0xe8   :  { %429 = vmatpush.msra.mxu1 %v333_v49  ;;  %464 = vmatpush.msrb.mxu2 %v459_v41  ;;  %v550_v49 = vld [vmem:[#allocation13 + $0x20] sm:$0xff]  ;;  %v605_v41 = vld [vmem:[#allocation14 + $0x70] sm:$0xff] }
  0xea   :  { %430 = vmatpush.msra.mxu1 %v332_v51  ;;  %465 = vmatpush.msrb.mxu2 %v458_v59  ;;  %v549_v51 = vld [vmem:[#allocation13 + $0x18] sm:$0xff]  ;;  %v604_v59 = vld [vmem:[#allocation14 + $0x68] sm:$0xff] }
  0xeb   :  { %350 = vmatpush.xpose.msra.mxu3 %v319_v53  ;;  %v313_v53 = vadd.f32 %v312_v42, %v245_v44  ;;  %v554_v42 = vld [vmem:[#allocation13 + $0x40] sm:$0xff]  ;;  %v553_v44 = vld [vmem:[#allocation13 + $0x38] sm:$0xff] }
  0xec   :  { %431 = vmatpush.msra.mxu1 %v331_v54  ;;  %466 = vmatpush.msrb.mxu2 %v457_v43  ;;  %v547_v54 = vld [vmem:[#allocation13 + $0x8] sm:$0xff] }
  0xed   :  { %v327_v35 = vmul.f32 %v313_v53, %v1164_v52  ;;  %v326_v38 = vmul.f32 %v313_v53, %v1168_v56  ;;  %v452_v52 = vld [vmem:[#allocation11 + $0x40] sm:$0xff]  ;;  %v451_v56 = vld [vmem:[#allocation11 + $0x38] sm:$0xff] }
  0xee   :  { %432 = vmatpush.msra.mxu1 %v330_v55  ;;  %467 = vmatpush.msrb.mxu2 %v456_v45  ;;  %v546_v55 = vld [vmem:[#allocation13] sm:$0xff] }
  0xef   :  { %351 = vmatpush.xpose.msra.mxu3 %v318_v57  ;;  %v329_v57 = vmul.f32 %v313_v53, %v1158_v48  ;;  %v454_v48 = vld [vmem:[#allocation11 + $0x50] sm:$0xff] }
  0xf1   :  { %433 = vmatpush.msra.mxu1 %v329_v57 }
  0xf2   :  { %352 = vmatmul.f32.vlgmr.msra.gmra.mxu3 %v267_v58  ;;  %v328_v58 = vmul.f32 %v313_v53, %v1161_v50  ;;  %v453_v50 = vld [vmem:[#allocation11 + $0x48] sm:$0xff]  ;;  %v548_v53 = vld [vmem:[#allocation13 + $0x10] sm:$0xff] }
  0xf3   :  { %566 = vmatpush.msrb.mxu3 %v561_v21 }
  0xf4   :  { %434 = vmatpush.msra.mxu1 %v328_v58 }
  0xf6   :  { %435 = vmatpush.msra.mxu1 %v327_v35 }
  0xf8   :  { %436 = vmatpush.msra.mxu1 %v326_v38  ;;  %v606_v38 = vld [vmem:[#allocation14 + $0x78] sm:$0xff] }
  0xf9   :  { %611 = vmatpush.msrb.mxu0 %v606_v38 }
  0xfa   :  { %355 = vmatmul.f32.gmra.mxu3 %v270_v60  ;;  %v455_v60 = vld [vmem:[#allocation11 + $0x58] sm:$0xff] }
  0xfb   :  { %468 = vmatpush.msrb.mxu2 %v455_v60  ;;  %612 = vmatpush.msrb.mxu0 %v605_v41  ;;  %v603_v60 = vld [vmem:[#allocation14 + $0x60] sm:$0xff] }
  0xfd   :  { %469 = vmatpush.msrb.mxu2 %v454_v48  ;;  %613 = vmatpush.msrb.mxu0 %v604_v59 }
  0xff   :  { %470 = vmatpush.msrb.mxu2 %v453_v50  ;;  %614 = vmatpush.msrb.mxu0 %v603_v60 }
 0x101   :  { %471 = vmatpush.msrb.mxu2 %v452_v52 }
 0x103   :  { %472 = vmatpush.msrb.mxu2 %v451_v56 }
 0x105   :  { %473 = vmatpush.msrb.mxu2 %v450_v63  ;;  %v600_v63 = vld [vmem:[#allocation14 + $0x48] sm:$0xff] }
 0x107   :  { %474 = vmatpush.msrb.mxu2 %v449_v0 }
 0x109   :  { %475 = vmatpush.msrb.mxu2 %v448_v2 }
 0x10b   :  { %476 = vmatpush.msrb.mxu2 %v447_v6 }
 0x10d   :  { %477 = vmatpush.msrb.mxu2 %v446_v7  ;;  %v734_v7 = vld [vmem:[%s1249_s9] ss:$0 sm:$0xff] }
 0x10f   :  { %478 = vmatpush.msrb.mxu2 %v445_v8  ;;  %v597_v8 = vld [vmem:[#allocation14 + $0x30] sm:$0xff] }
 0x111   :  { %479 = vmatpush.msrb.mxu2 %v444_v11 }
 0x175   :  { %v353_v12 = vpop.f32.mrf.mxu3 }
 0x176   :  { %v354_v14 = vadd.f32 %v353_v12, %v334_v10 }
 0x178   :  { %v360_v16 = vsel %vm359_vm0, %v354_v14, -inf }
 0x179   :  { %361 = vmax.xlane.f32.xlu0 %v360_v16 }
 0x17d   :  { %v356_v20 = vpop.f32.mrf.mxu3 }
 0x17e   :  { %v357_v22 = vadd.f32 %v356_v20, %v335_v18 }
 0x180   :  { %v363_v23 = vsel %vm359_vm0, %v357_v22, -inf }
 0x181   :  { %364 = vmax.xlane.f32.xlu0 %v363_v23 }
 0x1ec   :  { %v362_v30 = vpop.xlane.xlu0 %361 }
 0x1ed   :  { %v366_v31 = vsub.f32 %v354_v14, %v362_v30  ;;  %v732_v14 = vld [vmem:[%s1248_s8] ss:$0 sm:$0xff] }
 0x1ef   :  { %v368_v32 = vmul.f32 1.442695, %v366_v31 }
 0x1f1   :  { %740 = vpow2.f32 %v368_v32 }
 0x1f4   :  { %v365_v34 = vpop.xlane.xlu0 %364 }
 0x1f5   :  { %v367_v36 = vsub.f32 %v357_v22, %v365_v34  ;;  %v560_v22 = vld [vmem:[#allocation13 + $0x70] sm:$0xff]  ;;  %v559_v34 = vld [vmem:[#allocation13 + $0x68] sm:$0xff] }
 0x1f6   :  { %567 = vmatpush.msrb.mxu3 %v560_v22 }
 0x1f7   :  { %v741_v37 = vpop.eup %740  ;;  %v370_v39 = vmul.f32 1.442695, %v367_v36  ;;  %v558_v36 = vld [vmem:[#allocation13 + $0x60] sm:$0xff] }
 0x1f8   :  { %715 = vmatmul.msk.f32.vlgmr.msrb.gmra.mxu1 %vm359_vm0, %v741_v37  ;;  %568 = vmatpush.msrb.mxu3 %v559_v34 }
 0x1f9   :  { %742 = vpow2.f32 %v370_v39  ;;  %v556_v39 = vld [vmem:[#allocation13 + $0x50] sm:$0xff] }
 0x1fa   :  { %569 = vmatpush.msrb.mxu3 %v558_v36 }
 0x1ff   :  { %v1176_v40 = vpop.eup %742 }
 0x200   :  { %716 = vmatmul.msk.f32.gmra.mxu1 %vm359_vm0, %v1176_v40 }
 0x275   :  { %v403_v61 = vpop.f32.mrf.mxu1 }
 0x276   :  { %v409_v62 = vmax.f32 %v403_v61, 1e-30  ;;  %v602_v61 = vld [vmem:[#allocation14 + $0x58] sm:$0xff] }
 0x277   :  { %615 = vmatpush.msrb.mxu0 %v602_v61 }
 0x278   :  { %744 = vrcp.f32 %v409_v62  ;;  %v601_v62 = vld [vmem:[#allocation14 + $0x50] sm:$0xff] }
 0x279   :  { %616 = vmatpush.msrb.mxu0 %v601_v62 }
 0x27b   :  { %617 = vmatpush.msrb.mxu0 %v600_v63 }
 0x27d   :  { %v406_v1 = vpop.f32.mrf.mxu1 }
 0x27e   :  { %v745_v3 = vpop.eup %744  ;;  %v410_v4 = vmax.f32 %v406_v1, 1e-30  ;;  %v599_v1 = vld [vmem:[#allocation14 + $0x40] sm:$0xff] }
 0x27f   :  { %v413_v5 = vmul.f32 %v745_v3, %v741_v37  ;;  %v557_v37 = vld [vmem:[#allocation13 + $0x58] sm:$0xff]  ;;  %618 = vmatpush.msrb.mxu0 %v599_v1 }
 0x280   :  { %746 = vrcp.f32 %v410_v4  ;;  %570 = vmatpush.msrb.mxu3 %v557_v37  ;;  %v598_v4 = vld [vmem:[#allocation14 + $0x38] sm:$0xff]  ;;  %v737_v37 = vld [vmem:[%s1254_s14] ss:$0 sm:$0xff] }
 0x281   :  { %717 = vmatmul.msk.f32.vlgmr.msra.gmra.mxu1 %vm359_vm0, %v413_v5  ;;  %619 = vmatpush.msrb.mxu0 %v598_v4 }
 0x282   :  { %571 = vmatpush.msrb.mxu3 %v556_v39 }
 0x283   :  { %620 = vmatpush.msrb.mxu0 %v597_v8 }
 0x286   :  { %v747_v9 = vpop.eup %746 }
 0x287   :  { %v414_v10 = vmul.f32 %v747_v9, %v1176_v40  ;;  %v555_v40 = vld [vmem:[#allocation13 + $0x48] sm:$0xff] }
 0x288   :  { %572 = vmatpush.msrb.mxu3 %v555_v40 }
 0x289   :  { %718 = vmatmul.msk.f32.gmra.mxu1 %vm359_vm0, %v414_v10 }
 0x28a   :  { %573 = vmatpush.msrb.mxu3 %v554_v42 }
 0x28c   :  { %574 = vmatpush.msrb.mxu3 %v553_v44 }
 0x28e   :  { %575 = vmatpush.msrb.mxu3 %v552_v46 }
 0x290   :  { %576 = vmatpush.msrb.mxu3 %v551_v47 }
 0x292   :  { %577 = vmatpush.msrb.mxu3 %v550_v49 }
 0x294   :  { %578 = vmatpush.msrb.mxu3 %v549_v51 }
 0x296   :  { %579 = vmatpush.msrb.mxu3 %v548_v53 }
 0x298   :  { %580 = vmatpush.msrb.mxu3 %v547_v54 }
 0x29a   :  { %581 = vmatpush.msrb.mxu3 %v546_v55 }
 0x2fe   :  { %v438_v12 = vpop.f32.mrf.mxu1 }
 0x2ff   :  { %480 = vmatmul.f32.vlgmr.msrb.gmra.mxu2 %v438_v12  ;;  %v735_v12 = vld [vmem:[%s1250_s10] ss:$0 sm:$0xff] }
 0x306   :  { %v441_v13 = vpop.f32.mrf.mxu1 }
 0x307   :  { %483 = vmatmul.f32.gmra.mxu2 %v441_v13  ;;  %v596_v13 = vld [vmem:[#allocation14 + $0x28] sm:$0xff] }
 0x308   :  { %621 = vmatpush.msrb.mxu0 %v596_v13 }
 0x382   :  { %v481_v15 = vpop.f32.mrf.mxu2 }
 0x383   :  { %v482_v16 = vadd.f32 %v732_v14, %v481_v15 }
 0x385   :  { %v487_v17 = vadd.f32 %v482_v16, %v1132_v28  ;;  %v595_v16 = vld [vmem:[#allocation14 + $0x20] sm:$0xff] }
 0x386   :  { %622 = vmatpush.msrb.mxu0 %v595_v16 }
 0x387   :  { %491 = vadd.xlane.f32.xlu1 %v487_v17 }
 0x38a   :  { %v484_v18 = vpop.f32.mrf.mxu2 }
 0x38b   :  { %v485_v19 = vadd.f32 %v732_v14, %v484_v18 }
 0x38d   :  { %v488_v20 = vadd.f32 %v485_v19, %v1135_v33  ;;  %v594_v19 = vld [vmem:[#allocation14 + $0x18] sm:$0xff] }
 0x38e   :  { %623 = vmatpush.msrb.mxu0 %v594_v19 }
 0x38f   :  { %493 = vadd.xlane.f32.xlu1 %v488_v20 }
 0x3fa   :  { %v492_v23 = vpop.xlane.xlu1 %491 }
 0x3fb   :  { %v495_v24 = vmul.f32 0.03125, %v492_v23 }
 0x3fd   :  { %v497_v26 = vsub.f32 %v487_v17, %v495_v24 }
 0x3ff   :  { %v1203_v28 = vmul.f32 %v1200_v25, %v497_v26  ;;  %v593_v26 = vld [vmem:[#allocation14 + $0x10] sm:$0xff] }
 0x400   :  { %624 = vmatpush.msrb.mxu0 %v593_v26 }
 0x401   :  { %v504_v27 = vmul.f32 %v1203_v28, %v1203_v28 }
 0x402   :  { %v494_v33 = vpop.xlane.xlu1 %493 }
 0x403   :  { %v496_v29 = vmul.f32 0.03125, %v494_v33  ;;  %506 = vadd.xlane.f32.xlu2 %v504_v27  ;;  %v591_v27 = vld [vmem:[#allocation14] sm:$0xff] }
 0x404   :  { %v736_v33 = vld [vmem:[%s1252_s12] ss:$0 sm:$0xff] }
 0x405   :  { %v498_v30 = vsub.f32 %v488_v20, %v496_v29 }
 0x407   :  { %v1208_v31 = vmul.f32 %v1200_v25, %v498_v30 }
 0x409   :  { %v505_v32 = vmul.f32 %v1208_v31, %v1208_v31 }
 0x40b   :  { %508 = vadd.xlane.f32.xlu2 %v505_v32 }
 0x476   :  { %v507_v57 = vpop.xlane.xlu2 %506 }
 0x477   :  { %v510_v58 = vmul.f32 0.03125, %v507_v57 }
 0x479   :  { %v512_v35 = vadd.f32 1e-05, %v510_v58 }
 0x47b   :  { %748 = vrsqrt.f32 %v512_v35  ;;  %vm520_vm2 = vweird.f32 %v512_v35 }
 0x47e   :  { %v509_v43 = vpop.xlane.xlu2 %508 }
 0x47f   :  { %v511_v45 = vmul.f32 0.03125, %v509_v43 }
 0x481   :  { %v749_v48 = vpop.eup %748  ;;  %v513_v50 = vadd.f32 1e-05, %v511_v45 }
 0x482   :  { %v515_v52 = vmul.f32 %v749_v48, %v512_v35  ;;  %vm521_vm1 = vweird.f32 %v749_v48 }
 0x483   :  { %750 = vrsqrt.f32 %v513_v50  ;;  %vm522_vm3 = vmor %vm520_vm2, %vm521_vm1  ;;  %vm530_vm5 = vweird.f32 %v513_v50 }
 0x484   :  { %v516_v56 = vmul.f32 %v749_v48, %v515_v52 }
 0x486   :  { %v517_v0 = vmul.f32 0.5, %v516_v56 }
 0x488   :  { %v518_v2 = vsub.f32 1.5, %v517_v0 }
 0x489   :  { %v751_v3 = vpop.eup %750 }
 0x48a   :  { %v519_v5 = vmul.f32 %v749_v48, %v518_v2  ;;  %v525_v6 = vmul.f32 %v751_v3, %v513_v50  ;;  %vm531_vm4 = vweird.f32 %v751_v3  ;;  %v738_v2 = vld [vmem:[%s1255_s15] ss:$0 sm:$0xff]  ;;  %s696_s15 = sshll.u32 %s996_s27, 4  ;;  %s697_s15 = int_to_ptr.vmem [resolvable:$true] %s696_s15 }
 0x48b   :  { %vm532_vm6 = vmor %vm530_vm5, %vm531_vm4 }
 0x48c   :  { %v523_v9 = vsel %vm522_vm3, %v749_v48, %v519_v5  ;;  %v526_v10 = vmul.f32 %v751_v3, %v525_v6  ;;  %v739_v6 = vld [vmem:[%s1256_s16] ss:$0 sm:$0xff] }
 0x48d   :  { %v534_v11 = vmul.f32 %v523_v9, %v1203_v28  ;;  %v592_v28 = vld [vmem:[#allocation14 + $0x8] sm:$0xff] }
 0x48e   :  { %v527_v14 = vmul.f32 0.5, %v526_v10  ;;  %625 = vmatpush.msrb.mxu0 %v592_v28 }
 0x48f   :  { %v539_v15 = vmul.f32 %v734_v7, %v534_v11 }
 0x490   :  { %v528_v17 = vsub.f32 1.5, %v527_v14  ;;  %626 = vmatpush.msrb.mxu0 %v591_v27 }
 0x491   :  { %v544_v18 = vadd.f32 %v735_v12, %v539_v15 }
 0x492   :  { %v529_v20 = vmul.f32 %v751_v3, %v528_v17 }
 0x493   :  { %582 = vmatmul.f32.vlgmr.msrb.gmra.mxu3 %v544_v18 }
 0x494   :  { %v533_v21 = vsel %vm532_vm6, %v751_v3, %v529_v20 }
 0x495   :  { %v535_v22 = vmul.f32 %v533_v21, %v1208_v31 }
 0x497   :  { %v540_v23 = vmul.f32 %v734_v7, %v535_v22 }
 0x499   :  { %v545_v24 = vadd.f32 %v735_v12, %v540_v23 }
 0x49b   :  { %585 = vmatmul.f32.gmra.mxu3 %v545_v24 }
 0x516   :  { %v583_v29 = vpop.f32.mrf.mxu3 }
 0x517   :  { %v584_v30 = vadd.f32 %v736_v33, %v583_v29 }
 0x519   :  { %v589_v32 = vmax.f32 %v584_v30, 0.0 }
 0x51b   :  { %627 = vmatmul.f32.vlgmr.msrb.gmra.mxu0 %v589_v32 }
 0x51e   :  { %v586_v34 = vpop.f32.mrf.mxu3 }
 0x51f   :  { %v587_v36 = vadd.f32 %v736_v33, %v586_v34 }
 0x521   :  { %v590_v31 = vmax.f32 %v587_v36, 0.0 }
 0x523   :  { %630 = vmatmul.f32.gmra.mxu0 %v590_v31 }
 0x598   :  { %v628_v39 = vpop.f32.mrf.mxu0 }
 0x599   :  { %v629_v40 = vadd.f32 %v737_v37, %v628_v39 }
 0x59b   :  { %v634_v42 = vadd.f32 %v629_v40, %v544_v18 }
 0x59d   :  { %638 = vadd.xlane.f32.xlu0 %v634_v42 }
 0x5a0   :  { %v631_v44 = vpop.f32.mrf.mxu0 }
 0x5a1   :  { %v632_v46 = vadd.f32 %v737_v37, %v631_v44 }
 0x5a3   :  { %v635_v47 = vadd.f32 %v632_v46, %v545_v24 }
 0x5a5   :  { %640 = vadd.xlane.f32.xlu1 %v635_v47 }
 0x610   :  { %v639_v49 = vpop.xlane.xlu0 %638 }
 0x611   :  { %v642_v51 = vmul.f32 0.03125, %v639_v49 }
 0x613   :  { %v644_v53 = vsub.f32 %v634_v42, %v642_v51 }
 0x615   :  { %v646_v54 = vmul.f32 %v1200_v25, %v644_v53 }
 0x617   :  { %v648_v55 = vmul.f32 %v646_v54, %v646_v54 }
 0x618   :  { %v641_v57 = vpop.xlane.xlu1 %640 }
 0x619   :  { %v643_v58 = vmul.f32 0.03125, %v641_v57  ;;  %650 = vadd.xlane.f32.xlu2 %v648_v55 }
 0x61b   :  { %v645_v35 = vsub.f32 %v635_v47, %v643_v58 }
 0x61d   :  { %v647_v38 = vmul.f32 %v1200_v25, %v645_v35 }
 0x61f   :  { %v649_v41 = vmul.f32 %v647_v38, %v647_v38 }
 0x621   :  { %652 = vadd.xlane.f32.xlu0 %v649_v41 }
 0x68c   :  { %v651_v59 = vpop.xlane.xlu2 %650 }
 0x68d   :  { %v654_v43 = vmul.f32 0.03125, %v651_v59 }
 0x68f   :  { %v656_v45 = vadd.f32 1e-05, %v654_v43 }
 0x691   :  { %752 = vrsqrt.f32 %v656_v45  ;;  %vm664_vm8 = vweird.f32 %v656_v45 }
 0x694   :  { %v653_v60 = vpop.xlane.xlu0 %652 }
 0x695   :  { %v655_v48 = vmul.f32 0.03125, %v653_v60 }
 0x697   :  { %v753_v50 = vpop.eup %752  ;;  %v657_v61 = vadd.f32 1e-05, %v655_v48 }
 0x698   :  { %v659_v52 = vmul.f32 %v753_v50, %v656_v45  ;;  %vm665_vm7 = vweird.f32 %v753_v50 }
 0x699   :  { %754 = vrsqrt.f32 %v657_v61  ;;  %vm666_vm9 = vmor %vm664_vm8, %vm665_vm7  ;;  %vm674_vm11 = vweird.f32 %v657_v61 }
 0x69a   :  { %v660_v62 = vmul.f32 %v753_v50, %v659_v52 }
 0x69c   :  { %v661_v56 = vmul.f32 0.5, %v660_v62 }
 0x69e   :  { %v662_v63 = vsub.f32 1.5, %v661_v56 }
 0x69f   :  { %v755_v0 = vpop.eup %754 }
 0x6a0   :  { %v663_v1 = vmul.f32 %v753_v50, %v662_v63  ;;  %v669_v25 = vmul.f32 %v755_v0, %v657_v61  ;;  %vm675_vm10 = vweird.f32 %v755_v0 }
 0x6a1   :  { %vm676_vm12 = vmor %vm674_vm11, %vm675_vm10 }
 0x6a2   :  { %v667_v3 = vsel %vm666_vm9, %v753_v50, %v663_v1  ;;  %v670_v4 = vmul.f32 %v755_v0, %v669_v25 }
 0x6a3   :  { %v678_v5 = vmul.f32 %v667_v3, %v646_v54 }
 0x6a4   :  { %v671_v7 = vmul.f32 0.5, %v670_v4 }
 0x6a5   :  { %v683_v8 = vmul.f32 %v738_v2, %v678_v5 }
 0x6a6   :  { %v672_v9 = vsub.f32 1.5, %v671_v7 }
 0x6a7   :  { %v688_v10 = vadd.f32 %v739_v6, %v683_v8 }
 0x6a8   :  { %v673_v11 = vmul.f32 %v755_v0, %v672_v9 }
 0x6a9   :  { %690 = vst [vmem:[#allocation16] sm:$0xff] %v688_v10 }
 0x6aa   :  { %v677_v12 = vsel %vm676_vm12, %v755_v0, %v673_v11 }
 0x6ab   :  { %v679_v13 = vmul.f32 %v677_v12, %v647_v38 }
 0x6ad   :  { %v684_v14 = vmul.f32 %v738_v2, %v679_v13 }
 0x6af   :  { %v689_v15 = vadd.f32 %v739_v6, %v684_v14 }
 0x6b1   :  { %691 = vst [vmem:[#allocation16 + $0x8] sm:$0xff] %v689_v15 }
 0x6b2   :  { %704 = dma.vmem_to_hbm [thread:$0]  %s697_s15, 256, %s699_s29, [#allocation4], %s985_s19, %s985_s19, %s986_s1  }
 0x6b3   :  { %982 = dma.done.wait [#allocation4], 256  }
 0x6b4   :  { %983 = vsyncadd [#allocation4], 4294967040 }
 0x6b5   :  { %709 = vsyncpa [#allocation3], 1 }
 0x6b6   :  { %710 = vsyncpa [#allocation6], 1 }
 0x6b7   :  { %711 = vsyncpa [#allocation9], 1 }
 0x6b8   :  { %712 = vsyncpa [#allocation12], 1 }
 0x6b9   :  { %713 = vsyncpa [#allocation15], 1 }
 0x6ba   :  { %714 = vsyncpa [#allocation4], 1 }

</bundles_post_ra>
